<compile_context>
chip_gen: v6e
topology: v6e:2x2x1
jax: 0.10.0
libtpu: 0.0.40
codegen_flags: <defaults>
</compile_context>

<pallas_src>
import functools

import jax
import jax.numpy as jnp
from jax import lax
from jax.experimental import pallas as pl
from jax.experimental.pallas import tpu as pltpu

_LANES = 128
_SUBLANES = 8


def _ctrl_loss_block_kernel(net_ref, col_ref, wb_ref, diag_ref, off_ref,
                            part_ref, *, tm: int, batch: int):
    """One row-tile of the CTRL loss, streamed in the raw interleaved layout.

    net_ref : (tm, 3B)   raw row tile of net.reshape(B, 3B); lane 3j+c holds
                         channel c of column j.
    col_ref : (1, 3B)    int32 per-lane map: j for sim lanes (c==0), -1 else.
    wb_ref  : (1, 3B)    f32 per-lane base weight: 1/B on sim lanes, 0 else.
    diag_ref: (2, B)     [diag(p_reg); diag(l_reg)], resident.
    off_ref : (2, B)     [offset_p; offset_l] labels, resident.
    part_ref: (1, 8, 128) per-block partial sums; row 0 = align, row 1 = reg.
    """
    pid = pl.program_id(0)
    r0 = pid * tm
    lanes3 = 3 * batch

    val = net_ref[...].astype(jnp.float32)                     # (tm, 3B)

    # "sim-diagonal" lanes of this tile: local row r matches column j encoded
    # in col_ref (non-sim lanes carry -1 and never match).  Shift the column
    # map by r0 once per tile (a (1, 3B) row op) instead of per element.
    rowl = lax.broadcasted_iota(jnp.int32, (tm, lanes3), 0)    # local row idx
    col_local = col_ref[...] - r0                              # (1, 3B)
    diag_sim = rowl == col_local                               # (tm, 3B) bool

    # softplus((1 - 2*I) * sim), numerically stable.  Non-sim lanes are
    # computed too (interleaved layout) but get weight 0 below.
    x = jnp.where(diag_sim, -val, val)
    sp = jnp.maximum(x, 0.0) + jnp.log(1.0 + jnp.exp(-jnp.abs(x)))

    # weight = sel_sim * (1/B + I):  w_base on sim lanes, +1 on the sim diag.
    wb = wb_ref[...]                                           # (1, 3B)
    w = jnp.where(diag_sim, wb + 1.0, wb)                      # (tm, 3B)
    align_part = jnp.sum(sp * w)

    # Regression term over the tiny resident (2, B) diagonals; block 0 emits
    # the full sum, other blocks emit 0 (keeps every output block written).
    reg_all = jnp.sum(jnp.abs(diag_ref[...] - off_ref[...]))
    reg_part = jnp.where(pid == 0, reg_all, 0.0)

    # Single unmasked (8, 128) vreg store: row 0 = align, row 1 = reg, rest 0.
    r8 = lax.broadcasted_iota(jnp.int32, (_SUBLANES, _LANES), 0)
    part_ref[0] = jnp.where(r8 == 0, align_part,
                            jnp.where(r8 == 1, reg_part, 0.0))


def _pick_row_tile(batch: int, sub: int, itemsize: int, max_rows: int) -> int:
    """Largest row tile that (a) divides `batch`, (b) is a multiple of the
    sublane tile, (c) keeps one (tm, 3B) buffer under ~4 MiB (double-buffered
    8 MiB fits every generation's scoped-VMEM default), and (d) yields a grid
    of >= 4 steps (preferring an even count for v7x megacore)."""
    if batch % sub != 0:
        return batch  # single full-array block (block_shape == array shape)
    per_block_budget = 4 * 1024 * 1024          # bytes per input buffer
    cap = min(per_block_budget // (3 * batch * itemsize),
              max(batch // 4, sub),             # nb >= 4 when possible
              max_rows)
    cap = max(sub, (cap // sub) * sub)
    best = sub
    best_even = None
    d = sub
    limit = min(batch, cap)
    while d <= limit:
        if batch % d == 0:
            best = d
            if (batch // d) % 2 == 0:
                best_even = d
        d += sub
    return best_even if best_even is not None else best


def ctrl_loss(net, offset_label, lambda_reg, *, max_rows_per_tile: int = 512):
    """net: (B, B, 3), offset_label: (B, 2) -> scalar loss (f32)."""
    B = net.shape[0]
    assert net.shape == (B, B, 3), net.shape
    assert offset_label.shape == (B, 2), offset_label.shape
    lanes3 = 3 * B

    # Keep bf16 in bf16 (halves HBM bytes); everything computes in f32.
    compute_dtype = jnp.bfloat16 if net.dtype == jnp.bfloat16 else jnp.float32
    net_c = net.astype(compute_dtype)

    # Free (no-copy) reshape of the contiguous (B, B, 3) buffer: lane 3j+c of
    # row i holds channel c of element (i, j).  No transpose, no extra pass.
    net2d = net_c.reshape(B, lanes3)

    # Tiny O(B) side inputs (negligible HBM):
    lane = jnp.arange(lanes3, dtype=jnp.int32)
    is_sim = (lane % 3) == 0
    col_of_lane = jnp.where(is_sim, lane // 3, -1).reshape(1, lanes3)
    w_base = jnp.where(is_sim, jnp.float32(1.0 / B),
                       jnp.float32(0.0)).reshape(1, lanes3)
    idx = jnp.arange(B)
    diag_pl = net_c[idx, idx, 1:]                       # (B, 2): p, l diagonals
    diag_t = jnp.transpose(diag_pl.astype(jnp.float32), (1, 0))   # (2, B)
    off_t = jnp.transpose(offset_label.astype(jnp.float32), (1, 0))  # (2, B)

    sub = 16 if compute_dtype == jnp.bfloat16 else 8
    itemsize = 2 if compute_dtype == jnp.bfloat16 else 4
    tm = _pick_row_tile(B, sub, itemsize, max_rows_per_tile)
    nb = B // tm

    kernel = functools.partial(_ctrl_loss_block_kernel, tm=tm, batch=B)

    partials = pl.pallas_call(
        kernel,
        out_shape=jax.ShapeDtypeStruct((nb, _SUBLANES, _LANES), jnp.float32),
        grid=(nb,),
        in_specs=[
            pl.BlockSpec((tm, lanes3), lambda i: (i, 0)),   # streamed row tile
            pl.BlockSpec((1, lanes3), lambda i: (0, 0)),    # column-of-lane map
            pl.BlockSpec((1, lanes3), lambda i: (0, 0)),    # base weights
            pl.BlockSpec((2, B), lambda i: (0, 0)),         # reg diagonals
            pl.BlockSpec((2, B), lambda i: (0, 0)),         # offset labels
        ],
        out_specs=pl.BlockSpec((1, _SUBLANES, _LANES), lambda i: (i, 0, 0)),
        compiler_params=pltpu.CompilerParams(
            dimension_semantics=("parallel",)),
    )(net2d, col_of_lane, w_base, diag_t, off_t)

    # Tiny final reduction + lambda_reg combine in plain JAX (no recompile per
    # lambda_reg value; keeps the grid axis fully parallel for v7x megacore).
    # Note: f32 block-wise accumulation can drift a few ULPs from the
    # reference for very large B.
    loss_align = jnp.sum(partials[:, 0, 0]) / jnp.float32(B * B)
    loss_reg = jnp.sum(partials[:, 1, 0]) / jnp.float32(2 * B)
    return loss_align + jnp.asarray(lambda_reg, jnp.float32) * loss_reg


def ctrl_loss_ref(net, offset_label, lambda_reg):
    """Pure-JAX reference mirroring the PyTorch forward."""
    B = net.shape[0]
    net = net.astype(jnp.float32)
    off = offset_label.astype(jnp.float32)
    sim = net[:, :, 0]
    p_reg = net[:, :, 1]
    l_reg = net[:, :, 2]
    eye = jnp.eye(B, dtype=jnp.float32)
    mask = jnp.ones((B, B), jnp.float32) - 2.0 * eye
    para_mat = eye + jnp.ones((B, B), jnp.float32) / B
    loss_mat = jnp.log(1.0 + jnp.exp(mask * sim)) * para_mat
    loss_align = jnp.mean(loss_mat)
    p_diag = (p_reg * eye) @ jnp.ones((B, 1), jnp.float32)
    l_diag = (l_reg * eye) @ jnp.ones((B, 1), jnp.float32)
    offset_pred = jnp.concatenate([p_diag, l_diag], axis=1)
    loss_reg = jnp.mean(jnp.abs(offset_pred - off))
    return loss_align + lambda_reg * loss_reg


if __name__ == "__main__":
    key = jax.random.PRNGKey(0)
    k1, k2 = jax.random.split(key)

    # Small shape matching the module's interface (net is (B, B, 3)).
    B = 8
    lambda_reg = 1.0
    net = jax.random.normal(k1, (B, B, 3), dtype=jnp.float32)
    offset_label = jax.random.normal(k2, (B, 2), dtype=jnp.float32)
    loss = jax.block_until_ready(ctrl_loss(net, offset_label, lambda_reg))
    ref = ctrl_loss_ref(net, offset_label, lambda_reg)
    assert jnp.allclose(loss, ref, rtol=1e-5, atol=1e-5), (loss, ref)

    # Multi-block (grid = 4, parallel) f32 path.
    B2 = 32
    net2 = jax.random.normal(k1, (B2, B2, 3), dtype=jnp.float32)
    off2 = jax.random.normal(k2, (B2, 2), dtype=jnp.float32)
    loss2 = jax.block_until_ready(ctrl_loss(net2, off2, 0.5))
    ref2 = ctrl_loss_ref(net2, off2, 0.5)
    assert jnp.allclose(loss2, ref2, rtol=1e-5, atol=1e-5), (loss2, ref2)

    # bf16 fast path (grid = 4, 16-row sublane tiles).
    B3 = 64
    net3 = jax.random.normal(k1, (B3, B3, 3), dtype=jnp.float32).astype(
        jnp.bfloat16)
    off3 = jax.random.normal(k2, (B3, 2), dtype=jnp.float32)
    loss3 = jax.block_until_ready(ctrl_loss(net3, off3, 2.0))
    ref3 = ctrl_loss_ref(net3, off3, 2.0)
    assert jnp.allclose(loss3, ref3, rtol=1e-4, atol=1e-4), (loss3, ref3)

    print("KERNEL_OK")
</pallas_src>

<mosaic_0001>
module attributes {stable_mosaic.version = 11 : i64} {
  func.func @_ctrl_loss_block_kernel(%arg0: i32, %arg1: memref<8x24xf32, #tpu.memory_space<vmem>>, %arg2: memref<1x24xi32, #tpu.memory_space<vmem>>, %arg3: memref<1x24xf32, #tpu.memory_space<vmem>>, %arg4: memref<2x8xf32, #tpu.memory_space<vmem>>, %arg5: memref<2x8xf32, #tpu.memory_space<vmem>>, %arg6: memref<1x8x128xf32, #tpu.memory_space<vmem>>) attributes {dimension_semantics = [#tpu.dimension_semantics<parallel>], iteration_bounds = array<i64: 1>, scalar_prefetch = 0 : i64, scratch_operands = 0 : i64, tpu.core_type = #tpu.core_type<tc>, window_params = [{transform_indices = @transform_0, window_bounds = array<i64: 8, 24>}, {pipeline_mode = #tpu.pipeline_mode<synchronous>, transform_indices = @transform_1, window_bounds = array<i64: 1, 24>}, {pipeline_mode = #tpu.pipeline_mode<synchronous>, transform_indices = @transform_2, window_bounds = array<i64: 1, 24>}, {pipeline_mode = #tpu.pipeline_mode<synchronous>, transform_indices = @transform_3, window_bounds = array<i64: 2, 8>}, {pipeline_mode = #tpu.pipeline_mode<synchronous>, transform_indices = @transform_4, window_bounds = array<i64: 2, 8>}, {transform_indices = @transform_5, window_bounds = array<i64: 1, 8, 128>}]} {
    %c8_i32 = arith.constant 8 : i32
    %0 = arith.muli %arg0, %c8_i32 : i32
    %c0 = arith.constant 0 : index
    %c0_0 = arith.constant 0 : index
    %1 = vector.load %arg1[%c0, %c0_0] : memref<8x24xf32, #tpu.memory_space<vmem>>, vector<8x24xf32>
    %2 = tpu.iota {dimensions = array<i32: 0>} : vector<8x24xi32>
    %c0_1 = arith.constant 0 : index
    %c0_2 = arith.constant 0 : index
    %3 = vector.load %arg2[%c0_1, %c0_2] : memref<1x24xi32, #tpu.memory_space<vmem>>, vector<1x24xi32>
    %4 = vector.broadcast %0 : i32 to vector<1x24xi32>
    %5 = arith.subi %3, %4 : vector<1x24xi32>
    %6 = vector.broadcast %5 : vector<1x24xi32> to vector<8x24xi32>
    %7 = arith.cmpi eq, %2, %6 : vector<8x24xi32>
    %cst = arith.constant 0.000000e+00 : f32
    %8 = vector.broadcast %cst : f32 to vector<8x24xf32>
    %9 = arith.subf %8, %1 : vector<8x24xf32>
    %10 = arith.select %7, %9, %1 : vector<8x24xi1>, vector<8x24xf32>
    %cst_3 = arith.constant 0.000000e+00 : f32
    %11 = vector.broadcast %cst_3 : f32 to vector<8x24xf32>
    %12 = arith.maximumf %10, %11 : vector<8x24xf32>
    %13 = math.absf %10 : vector<8x24xf32>
    %cst_4 = arith.constant 0.000000e+00 : f32
    %14 = vector.broadcast %cst_4 : f32 to vector<8x24xf32>
    %15 = arith.subf %14, %13 : vector<8x24xf32>
    %16 = math.exp %15 : vector<8x24xf32>
    %cst_5 = arith.constant 1.000000e+00 : f32
    %17 = vector.broadcast %cst_5 : f32 to vector<8x24xf32>
    %18 = arith.addf %17, %16 : vector<8x24xf32>
    %19 = math.log %18 : vector<8x24xf32>
    %20 = arith.addf %12, %19 : vector<8x24xf32>
    %c0_6 = arith.constant 0 : index
    %c0_7 = arith.constant 0 : index
    %21 = vector.load %arg3[%c0_6, %c0_7] : memref<1x24xf32, #tpu.memory_space<vmem>>, vector<1x24xf32>
    %cst_8 = arith.constant 1.000000e+00 : f32
    %22 = vector.broadcast %cst_8 : f32 to vector<1x24xf32>
    %23 = arith.addf %21, %22 : vector<1x24xf32>
    %24 = vector.shape_cast %23 : vector<1x24xf32> to vector<1x24xf32>
    %25 = vector.broadcast %24 : vector<1x24xf32> to vector<8x24xf32>
    %26 = vector.shape_cast %21 : vector<1x24xf32> to vector<1x24xf32>
    %27 = vector.broadcast %26 : vector<1x24xf32> to vector<8x24xf32>
    %28 = arith.select %7, %25, %27 : vector<8x24xi1>, vector<8x24xf32>
    %29 = arith.mulf %20, %28 : vector<8x24xf32>
    %30 = vector.shape_cast %29 : vector<8x24xf32> to vector<1x8x24xf32>
    %cst_9 = arith.constant dense<0.000000e+00> : vector<1xf32>
    %31 = vector.multi_reduction <add>, %30, %cst_9 [1, 2] : vector<1x8x24xf32> to vector<1xf32>
    %32 = vector.shape_cast %31 : vector<1xf32> to vector<1x1x1xf32>
    %33 = vector.extract %32[0, 0, 0] : f32 from vector<1x1x1xf32>
    %c0_10 = arith.constant 0 : index
    %c0_11 = arith.constant 0 : index
    %34 = vector.load %arg4[%c0_10, %c0_11] : memref<2x8xf32, #tpu.memory_space<vmem>>, vector<2x8xf32>
    %c0_12 = arith.constant 0 : index
    %c0_13 = arith.constant 0 : index
    %35 = vector.load %arg5[%c0_12, %c0_13] : memref<2x8xf32, #tpu.memory_space<vmem>>, vector<2x8xf32>
    %36 = arith.subf %34, %35 : vector<2x8xf32>
    %37 = math.absf %36 : vector<2x8xf32>
    %38 = vector.shape_cast %37 : vector<2x8xf32> to vector<1x2x8xf32>
    %cst_14 = arith.constant dense<0.000000e+00> : vector<1xf32>
    %39 = vector.multi_reduction <add>, %38, %cst_14 [1, 2] : vector<1x2x8xf32> to vector<1xf32>
    %40 = vector.shape_cast %39 : vector<1xf32> to vector<1x1x1xf32>
    %41 = vector.extract %40[0, 0, 0] : f32 from vector<1x1x1xf32>
    %c0_i32 = arith.constant 0 : i32
    %42 = arith.cmpi eq, %arg0, %c0_i32 : i32
    %cst_15 = arith.constant 0.000000e+00 : f32
    %43 = arith.select %42, %41, %cst_15 : f32
    %44 = tpu.iota {dimensions = array<i32: 0>} : vector<8x128xi32>
    %c0_i32_16 = arith.constant 0 : i32
    %45 = vector.broadcast %c0_i32_16 : i32 to vector<8x128xi32>
    %46 = arith.cmpi eq, %44, %45 : vector<8x128xi32>
    %c1_i32 = arith.constant 1 : i32
    %47 = vector.broadcast %c1_i32 : i32 to vector<8x128xi32>
    %48 = arith.cmpi eq, %44, %47 : vector<8x128xi32>
    %cst_17 = arith.constant 0.000000e+00 : f32
    %49 = vector.broadcast %43 : f32 to vector<8x128xf32>
    %50 = vector.broadcast %cst_17 : f32 to vector<8x128xf32>
    %51 = arith.select %48, %49, %50 : vector<8x128xi1>, vector<8x128xf32>
    %52 = vector.broadcast %33 : f32 to vector<8x128xf32>
    %53 = arith.select %46, %52, %51 : vector<8x128xi1>, vector<8x128xf32>
    %c0_18 = arith.constant 0 : index
    %c0_19 = arith.constant 0 : index
    %c0_20 = arith.constant 0 : index
    %54 = vector.load %arg6[%c0_18, %c0_19, %c0_20] : memref<1x8x128xf32, #tpu.memory_space<vmem>>, vector<1x8x128xf32>
    %55 = vector.shape_cast %54 : vector<1x8x128xf32> to vector<8x128xf32>
    %56 = vector.shape_cast %53 : vector<8x128xf32> to vector<1x8x128xf32>
    tpu.vector_store %arg6[%c0_18, %c0_19, %c0_20], %56 {strides = array<i32>} : memref<1x8x128xf32, #tpu.memory_space<vmem>>, vector<1x8x128xf32>,
    return
  }
  func.func @transform_0(%arg0: i32) -> (i32, i32) {
    %c0_i32 = arith.constant 0 : i32
    %c0_i32_0 = arith.constant 0 : i32
    return %arg0, %c0_i32 : i32, i32
  }
  func.func @transform_1(%arg0: i32) -> (i32, i32) {
    %c0_i32 = arith.constant 0 : i32
    %c0_i32_0 = arith.constant 0 : i32
    %c0_i32_1 = arith.constant 0 : i32
    return %c0_i32, %c0_i32_0 : i32, i32
  }
  func.func @transform_2(%arg0: i32) -> (i32, i32) {
    %c0_i32 = arith.constant 0 : i32
    %c0_i32_0 = arith.constant 0 : i32
    %c0_i32_1 = arith.constant 0 : i32
    return %c0_i32, %c0_i32_0 : i32, i32
  }
  func.func @transform_3(%arg0: i32) -> (i32, i32) {
    %c0_i32 = arith.constant 0 : i32
    %c0_i32_0 = arith.constant 0 : i32
    %c0_i32_1 = arith.constant 0 : i32
    return %c0_i32, %c0_i32_0 : i32, i32
  }
  func.func @transform_4(%arg0: i32) -> (i32, i32) {
    %c0_i32 = arith.constant 0 : i32
    %c0_i32_0 = arith.constant 0 : i32
    %c0_i32_1 = arith.constant 0 : i32
    return %c0_i32, %c0_i32_0 : i32, i32
  }
  func.func @transform_5(%arg0: i32) -> (i32, i32, i32) {
    %c0_i32 = arith.constant 0 : i32
    %c0_i32_0 = arith.constant 0 : i32
    %c0_i32_1 = arith.constant 0 : i32
    return %arg0, %c0_i32, %c0_i32_0 : i32, i32, i32
  }
}

</mosaic_0001>

<bundles_post_ra>
// kernel: tpu_custom_call.1
= control target key start
LH: loop header
LB: loop body
LE: loop exit
PB: predicated region body
PF: predicated region fallthrough
CT: control target
= control target key end

     0   :  { %10 = vsyncpa [#allocation3], 0  ;;  %s266_s0 = inlined_call_operand.hbm [shape: f32[8,24], index: 0, kind: input, shape index: {}]   ;;  %s267_s1 = inlined_call_operand.vmem [shape: s32[1,24], index: 1, kind: input, shape index: {}]   ;;  %s268_s2 = inlined_call_operand.hbm [shape: f32[1,24], index: 2, kind: input, shape index: {}]   ;;  %s269_s3 = inlined_call_operand.vmem [shape: f32[2,8], index: 3, kind: input, shape index: {}]   ;;  %s270_s4 = inlined_call_operand.vmem [shape: f32[2,8], index: 4, kind: input, shape index: {}]   ;;  %s271_s5 = inlined_call_operand.hbm [shape: f32[1,8,128], index: 5, kind: output, shape index: {}]  }
   0x1   :  { %11 = vsyncpa [#allocation6], 0 }
   0x2   :  { %12 = vsyncpa [#allocation4], 0  ;;  %s213_s18 = smov [#allocation2]   ;;  %s214_s20 = smov [#allocation5]  }
   0x3   :  { %s19_s19 = sshll.u32 %s213_s18, 4  ;;  %s31_s21 = sshll.u32 %s214_s20, 4  ;;  %s20_s19 = int_to_ptr.vmem [resolvable:$true] %s19_s19  ;;  %s32_s21 = int_to_ptr.vmem [resolvable:$true] %s31_s21 }
   0x4   :  { %s155_s22 = scalar_lea.vmem %s20_s19, 128  ;;  %p160_p1 = scmp.lt.s32.totalorder %s20_s19, %s20_s19 }
   0x5   :  { %p156_p0 = scmp.ne.s32.totalorder %s20_s19, %s155_s22  ;;  %p161_p2 = scmp.lt.s32.totalorder %s155_s22, %s155_s22 }
   0x7   :  { %p162_p3 = por %p161_p2, %p160_p1 }
   0x9   :  { %p163_p4 = pnand %p162_p3, %p156_p0 }
   0xb   :  { %166 = shalt.err (!%p163_p4)
}
   0xc   :  { %22 = dma.hbm_to_vmem [thread:$0]  %s266_s0, 128, %s20_s19, [#allocation3]  }
   0xd   :  { %s175_s25 = scalar_lea.vmem %s32_s21, 16  ;;  %s179_s26 = scalar_lea.vmem %s32_s21, 32 }
   0xe   :  { %p176_p5 = scmp.ne.s32.totalorder %s32_s21, %s175_s25  ;;  %p180_p6 = scmp.lt.s32.totalorder %s32_s21, %s32_s21 }
   0xf   :  { %p181_p7 = scmp.lt.s32.totalorder %s179_s26, %s175_s25 }
  0x11   :  { %p182_p8 = por %p181_p7, %p180_p6 }
  0x13   :  { %p183_p9 = pnand %p182_p8, %p176_p5 }
  0x15   :  { %186 = shalt.err (!%p183_p9)
}
  0x16   :  { %34 = dma.hbm_to_vmem [thread:$0]  %s268_s2, 16, %s32_s21, [#allocation6]  }
  0x17   :  { %207 = dma.done.wait [#allocation3], 128  }
  0x18   :  { %208 = vsyncadd [#allocation3], 4294967168 }
  0x19   :  { %209 = dma.done.wait [#allocation6], 16  }
  0x1a   :  { %210 = vsyncadd [#allocation6], 4294967280  ;;  %v47_v0 = vlaneseq  ;;  %v46_v2 = vld [vmem:[#allocation2] sm:$0xff]  ;;  %v68_v11 = vld [vmem:[#allocation5] sm:$0x1]  ;;  %vm84_vm1 = vcmask 195584  }
  0x1b   :  { %v135_v3 = vld [vmem:[%s267_s1] ss:$0 sm:$0xff]  ;;  %v57_v4 = vsub.f32 0.0, %v46_v2  ;;  %v69_v12 = vadd.f32 1.0, %v68_v11  ;;  %vm99_vm2 = vcmask 58368  }
  0x1c   :  { %v48_v1 = vshrl.u32 %v47_v0, 7  ;;  %v95_v16 = vld [vmem:[%s269_s3] sm:$0x3] }
  0x1d   :  { %v96_v17 = vld [vmem:[%s270_s4] sm:$0x3]  ;;  %s215_s4 = smov [#allocation7]  }
  0x1e   :  { %vm56_vm0 = vcmp.eq.s32.totalorder %v48_v1, %v135_v3  ;;  %v73_v13 = vsub.s32 0, %v48_v1  ;;  %v97_v21 = vsub.f32 %v95_v16, %v96_v17  ;;  %vm113_vm3 = vcmp.eq.s32.totalorder %v48_v1, 1  ;;  %s125_s7 = sshll.u32 %s215_s4, 4  ;;  %s126_s7 = int_to_ptr.vmem [resolvable:$true] %s125_s7 }
  0x1f   :  { %v58_v5 = vsel %vm56_vm0, %v57_v4, %v46_v2  ;;  %vm112_vm4 = vcmp.eq.s32.totalorder %v48_v1, 0  ;;  %s187_s9 = scalar_lea.vmem %s126_s7, 128  ;;  %p192_p11 = scmp.lt.s32.totalorder %s126_s7, %s126_s7 }
  0x20   :  { %v60_v6 = vand.u32 2147483647, %v58_v5  ;;  %v74_v14 = vrot.slane %v69_v12, %v73_v13  ;;  %v80_v15 = vrot.slane %v68_v11, %v73_v13  ;;  %v59_v18 = vmax.f32 %v58_v5, 0.0  ;;  %p188_p10 = scmp.ne.s32.totalorder %s126_s7, %s187_s9  ;;  %p193_p12 = scmp.lt.s32.totalorder %s187_s9, %s187_s9 }
  0x21   :  { %v98_v25 = vand.u32 2147483647, %v97_v21 }
  0x22   :  { %v61_v7 = vsub.f32 0.0, %v60_v6  ;;  %v82_v22 = vsel %vm56_vm0, %v74_v14, %v80_v15  ;;  %p194_p13 = por %p193_p12, %p192_p11 }
  0x23   :  { %v100_v27 = vsel %vm99_vm2, %v98_v25, 0.0 }
  0x24   :  { %v62_v8 = vmul.f32 1.442695, %v61_v7  ;;  %p195_p0 = pnand %p194_p13, %p188_p10 }
  0x26   :  { %143 = vpow2.f32 %v62_v8 }
  0x33   :  { %v144_v9 = vpop.eup %143 }
  0x34   :  { %v64_v10 = vadd.f32 1.0, %v144_v9 }
  0x36   :  { %145 = vlog2.f32 %v64_v10 }
  0x43   :  { %v146_v19 = vpop.eup %145 }
  0x44   :  { %v66_v20 = vmul.f32 0.6931472, %v146_v19 }
  0x46   :  { %v67_v23 = vadd.f32 %v66_v20, %v59_v18 }
  0x48   :  { %v83_v24 = vmul.f32 %v82_v22, %v67_v23 }
  0x4a   :  { %v85_v26 = vsel %vm84_vm1, %v83_v24, 0.0 }
  0x4b   :  { %86 = vadd.xlane.f32.xlu0 %v85_v26 }
  0x4f   :  { %101 = vadd.xlane.f32.xlu0 %v100_v27 }
  0xd4   :  { %v87_v28 = vpop.xlane.xlu0 %86 }
  0xd5   :  { %v88_v29 = vrot.slane %v87_v28, 4 }
  0xd7   :  { %v89_v30 = vadd.f32 %v88_v29, %v87_v28 }
  0xd8   :  { %v102_v31 = vpop.xlane.xlu0 %101 }
  0xd9   :  { %v90_v32 = vrot.slane %v89_v30, 2  ;;  %v103_v33 = vrot.slane %v102_v31, 4 }
  0xdb   :  { %v104_v34 = vadd.f32 %v103_v33, %v102_v31  ;;  %v91_v35 = vadd.f32 %v90_v32, %v89_v30 }
  0xdd   :  { %v105_v36 = vrot.slane %v104_v34, 2  ;;  %v92_v37 = vrot.slane %v91_v35, 1 }
  0xdf   :  { %v106_v38 = vadd.f32 %v105_v36, %v104_v34  ;;  %v93_v39 = vadd.f32 %v92_v37, %v91_v35 }
  0xe1   :  { %136 = vpush %v93_v39  ;;  %v107_v40 = vrot.slane %v106_v38, 1 }
  0xe3   :  { %v108_v41 = vadd.f32 %v107_v40, %v106_v38 }
  0xe5   :  { %138 = vpush %v108_v41 }
 0x112   :  { %s137_s3 = spop %136 }
 0x113   :  { %v116_v43 = vstv %s137_s3 }
 0x116   :  { %s139_s8 = spop %138 }
 0x117   :  { %v114_v42 = vstv %s139_s8 }
 0x118   :  { %v115_v44 = vsel %vm113_vm3, %v114_v42, 0.0 }
 0x119   :  { %v117_v45 = vsel %vm112_vm4, %v116_v43, %v115_v44 }
 0x11a   :  { %118 = vst [vmem:[#allocation7] sm:$0xff] %v117_v45 }
 0x11b   :  { %198 = shalt.err (!%p195_p0)
}
 0x11c   :  { %128 = dma.vmem_to_hbm [thread:$0]  %s126_s7, 128, %s271_s5, [#allocation4]  }
 0x11d   :  { %211 = dma.done.wait [#allocation4], 128  }
 0x11e   :  { %212 = vsyncadd [#allocation4], 4294967168 }
 0x11f   :  { %132 = vsyncpa [#allocation3], 1 }
 0x120   :  { %133 = vsyncpa [#allocation6], 1 }
 0x121   :  { %134 = vsyncpa [#allocation4], 1 }

</bundles_post_ra>
